<compile_context>
chip_gen: v7x
topology: tpu7x:2x2x1
jax: 0.10.0
libtpu: 0.0.40
codegen_flags: <defaults>
</compile_context>

<pallas_src>
import jax
import jax.numpy as jnp
from jax.experimental import pallas as pl
from jax.experimental.pallas import tpu as pltpu


def _normalize_kernel(kinv_sref, pts_ref, pts1_ref, pts2_ref):
    # kinv_sref: SMEM (B*9,)       -- flattened K_inv matrices (scalar prefetch)
    # pts_ref  : VMEM (bt, 4, nt)  -- lane-dense rows: [x1; y1; x2; y2]
    # pts1_ref : VMEM (bt, 3, nt)
    # pts2_ref : VMEM (bt, 3, nt)
    bt = pts_ref.shape[0]
    b0 = pl.program_id(0) * bt
    for bb in range(bt):                       # small static unroll (bt <= 8)
        b = b0 + bb
        x1 = pts_ref[bb, 0:1, :]
        y1 = pts_ref[bb, 1:2, :]
        x2 = pts_ref[bb, 2:3, :]
        y2 = pts_ref[bb, 3:4, :]
        for i in range(3):
            k0 = kinv_sref[b * 9 + 3 * i + 0]
            k1 = kinv_sref[b * 9 + 3 * i + 1]
            k2 = kinv_sref[b * 9 + 3 * i + 2]
            # homogeneous coordinate is implicitly 1 -> "+ k2"
            pts1_ref[bb, i:i + 1, :] = (k0 * x1 + k1 * y1 + k2).astype(pts1_ref.dtype)
            pts2_ref[bb, i:i + 1, :] = (k0 * x2 + k1 * y2 + k2).astype(pts2_ref.dtype)


def _num_tensorcores():
    """Best-effort TensorCores-per-device count (2 on megacore chips, else 1)."""
    try:
        info = pltpu.get_tpu_info()
        for name in ("num_cores", "core_count", "num_tensorcores",
                     "tensor_cores_per_chip", "cores_per_chip"):
            v = getattr(info, name, None)
            if v is not None:
                try:
                    v = int(v)
                except Exception:
                    continue
                if v > 0:
                    return v
    except Exception:
        pass
    try:
        kind = jax.devices()[0].device_kind.lower()
        if any(tag in kind for tag in ("7x", "v7", "v4", "v5p")):
            return 2
    except Exception:
        pass
    return 1


def _choose_tiles(B, N, num_cores):
    # Pad N only to a multiple of 128 (lane-dense, no wasted columns beyond
    # alignment), then pick nt as the largest 128-multiple divisor of n_pad
    # under a cap so blocks stay large but bounded.
    n_pad = pl.cdiv(N, 128) * 128
    NT_CAP = 4096
    n_units = n_pad // 128
    best = 1
    for d in range(1, n_units + 1):
        if n_units % d == 0 and d * 128 <= NT_CAP:
            best = d
    nt = best * 128

    # Batch tile: divisor of B, small static unroll, bounded VMEM footprint.
    # Lane-dense layout: per-step VMEM ~ 3 * bt * 8 * nt * 4 B (double-buffered
    # x2) => bt*nt <= 32768 keeps it ~6 MiB, comfortably inside all defaults.
    max_bt = max(1, min(8, (32 * 1024) // nt))
    bt = 1
    for d in range(1, B + 1):
        if B % d == 0 and d <= max_bt:
            bt = d

    # Megacore: on 2-TC chips make sure there are >= 2 grid steps; on
    # single-TC chips keep the fewest, largest steps.
    if num_cores >= 2:
        steps = (B // bt) * (n_pad // nt)
        if steps < 2:
            if bt > 1:
                bt = max(d for d in range(1, bt) if B % d == 0)
            elif nt % 256 == 0:
                nt //= 2
    return bt, nt, n_pad


def normalize_and_expand_k(pts, K_invs):
    """pts: (B, N, 4); K_invs: (B, 3, 3).

    Returns (pts1, pts2, T1, T2) matching the PyTorch module:
      pts1, pts2: (B, 3, N); T1 = T2 = K_invs.
    """
    B, N, C = pts.shape
    assert C == 4, "pts last dim must be 4 ([x1, y1, x2, y2])"
    dtype = pts.dtype

    num_cores = _num_tensorcores()
    bt, nt, n_pad = _choose_tiles(B, N, num_cores)

    # One wrapper pass: transpose to lane-dense (B, 4, N) and (if needed) pad
    # the lane axis to n_pad; XLA fuses the pad into the transpose output.
    pts_t = jnp.transpose(pts, (0, 2, 1))                       # (B, 4, N)
    if n_pad != N:
        pts_t = jnp.pad(pts_t, ((0, 0), (0, 0), (0, n_pad - N)))

    # K_inv entries as a flat scalar-prefetch table in SMEM.
    k_flat = K_invs.astype(jnp.float32).reshape(B * 9)

    grid = (B // bt, n_pad // nt)
    pts1, pts2 = pl.pallas_call(
        _normalize_kernel,
        out_shape=(
            jax.ShapeDtypeStruct((B, 3, n_pad), dtype),
            jax.ShapeDtypeStruct((B, 3, n_pad), dtype),
        ),
        grid_spec=pltpu.PrefetchScalarGridSpec(
            num_scalar_prefetch=1,
            grid=grid,
            in_specs=[
                pl.BlockSpec((bt, 4, nt), lambda bi, ni, kref: (bi, 0, ni)),
            ],
            out_specs=[
                pl.BlockSpec((bt, 3, nt), lambda bi, ni, kref: (bi, 0, ni)),
                pl.BlockSpec((bt, 3, nt), lambda bi, ni, kref: (bi, 0, ni)),
            ],
        ),
        compiler_params=pltpu.CompilerParams(
            dimension_semantics=("parallel", "parallel")),
    )(k_flat, pts_t)

    if n_pad != N:
        # TODO(synk): for unaligned N a lane-masked tail store in-kernel would
        # avoid this extra slicing pass; kept simple since n_pad - N < 128.
        pts1 = pts1[:, :, :N]
        pts2 = pts2[:, :, :N]
    T1 = K_invs
    T2 = K_invs
    return pts1, pts2, T1, T2


def _reference(pts, K_invs):
    B, N, _ = pts.shape
    ones = jnp.ones((B, N, 1), pts.dtype)
    p1 = jnp.concatenate([pts[:, :, :2], ones], axis=2)       # (B, N, 3)
    p2 = jnp.concatenate([pts[:, :, 2:], ones], axis=2)       # (B, N, 3)
    pts1 = jnp.einsum("bij,bnj->bin", K_invs, p1)             # (B, 3, N)
    pts2 = jnp.einsum("bij,bnj->bin", K_invs, p2)             # (B, 3, N)
    return pts1, pts2, K_invs, K_invs


if __name__ == "__main__":
    key = jax.random.PRNGKey(0)

    # Deterministic synthetic K_inv: inverse of a simple pinhole intrinsics.
    fx, fy, cx, cy = 320.0, 320.0, 160.0, 120.0
    K = jnp.array([[fx, 0.0, cx],
                   [0.0, fy, cy],
                   [0.0, 0.0, 1.0]], dtype=jnp.float32)
    K_inv = jnp.linalg.inv(K)

    # Cases exercise: aligned N, unaligned N (128-pad + slice), batch tiling
    # bt > 1, and an N that is not a power-of-two multiple (1300 -> 1408).
    cases = [(2, 128), (3, 200), (8, 256), (2, 1300)]
    for case_idx, (B, N) in enumerate(cases):
        k_pts = jax.random.fold_in(key, case_idx)
        pts = jax.random.normal(k_pts, (B, N, 4), dtype=jnp.float32) * 100.0
        jitter = 1.0 + 0.01 * jnp.arange(B, dtype=jnp.float32)[:, None, None]
        K_invs = K_inv[None, :, :] * jitter                    # (B, 3, 3)

        pts1, pts2, T1, T2 = normalize_and_expand_k(pts, K_invs)
        jax.block_until_ready((pts1, pts2, T1, T2))

        r1, r2, rT1, rT2 = _reference(pts, K_invs)
        assert pts1.shape == r1.shape and pts2.shape == r2.shape
        assert jnp.allclose(pts1, r1, atol=1e-4, rtol=1e-4)
        assert jnp.allclose(pts2, r2, atol=1e-4, rtol=1e-4)
        assert jnp.allclose(T1, rT1)
        assert jnp.allclose(T2, rT2)

    print("KERNEL_OK")
</pallas_src>

<mosaic_0001>
module attributes {stable_mosaic.version = 11 : i64} {
  func.func @_normalize_kernel(%arg0: i32, %arg1: i32, %arg2: memref<18xf32, #tpu.memory_space<smem>>, %arg3: memref<2x4x128xf32, #tpu.memory_space<vmem>>, %arg4: memref<2x3x128xf32, #tpu.memory_space<vmem>>, %arg5: memref<2x3x128xf32, #tpu.memory_space<vmem>>) attributes {dimension_semantics = [#tpu.dimension_semantics<parallel>, #tpu.dimension_semantics<parallel>], iteration_bounds = array<i64: 1, 1>, scalar_prefetch = 1 : i64, scratch_operands = 0 : i64, tpu.core_type = #tpu.core_type<tc>, window_params = [{transform_indices = @transform_0, window_bounds = array<i64: 2, 4, 128>}, {transform_indices = @transform_1, window_bounds = array<i64: 2, 3, 128>}, {transform_indices = @transform_2, window_bounds = array<i64: 2, 3, 128>}]} {
    %c2_i32 = arith.constant 2 : i32
    %0 = arith.muli %arg0, %c2_i32 : i32
    %c0_i32 = arith.constant 0 : i32
    %1 = arith.addi %0, %c0_i32 : i32
    %c0 = arith.constant 0 : index
    %c0_0 = arith.constant 0 : index
    %c0_1 = arith.constant 0 : index
    %2 = vector.load %arg3[%c0, %c0_0, %c0_1] : memref<2x4x128xf32, #tpu.memory_space<vmem>>, vector<1x1x128xf32>
    %3 = vector.shape_cast %2 : vector<1x1x128xf32> to vector<1x128xf32>
    %c0_2 = arith.constant 0 : index
    %c1 = arith.constant 1 : index
    %c0_3 = arith.constant 0 : index
    %4 = vector.load %arg3[%c0_2, %c1, %c0_3] : memref<2x4x128xf32, #tpu.memory_space<vmem>>, vector<1x1x128xf32>
    %5 = vector.shape_cast %4 : vector<1x1x128xf32> to vector<1x128xf32>
    %c0_4 = arith.constant 0 : index
    %c2 = arith.constant 2 : index
    %c0_5 = arith.constant 0 : index
    %6 = vector.load %arg3[%c0_4, %c2, %c0_5] : memref<2x4x128xf32, #tpu.memory_space<vmem>>, vector<1x1x128xf32>
    %7 = vector.shape_cast %6 : vector<1x1x128xf32> to vector<1x128xf32>
    %c0_6 = arith.constant 0 : index
    %c3 = arith.constant 3 : index
    %c0_7 = arith.constant 0 : index
    %8 = vector.load %arg3[%c0_6, %c3, %c0_7] : memref<2x4x128xf32, #tpu.memory_space<vmem>>, vector<1x1x128xf32>
    %9 = vector.shape_cast %8 : vector<1x1x128xf32> to vector<1x128xf32>
    %c9_i32 = arith.constant 9 : i32
    %10 = arith.muli %1, %c9_i32 : i32
    %c0_i32_8 = arith.constant 0 : i32
    %11 = arith.addi %10, %c0_i32_8 : i32
    %c0_i32_9 = arith.constant 0 : i32
    %12 = arith.addi %11, %c0_i32_9 : i32
    %13 = arith.index_cast %12 : i32 to index
    %14 = memref.load %arg2[%13] : memref<18xf32, #tpu.memory_space<smem>>
    %c9_i32_10 = arith.constant 9 : i32
    %15 = arith.muli %1, %c9_i32_10 : i32
    %c0_i32_11 = arith.constant 0 : i32
    %16 = arith.addi %15, %c0_i32_11 : i32
    %c1_i32 = arith.constant 1 : i32
    %17 = arith.addi %16, %c1_i32 : i32
    %18 = arith.index_cast %17 : i32 to index
    %19 = memref.load %arg2[%18] : memref<18xf32, #tpu.memory_space<smem>>
    %c9_i32_12 = arith.constant 9 : i32
    %20 = arith.muli %1, %c9_i32_12 : i32
    %c0_i32_13 = arith.constant 0 : i32
    %21 = arith.addi %20, %c0_i32_13 : i32
    %c2_i32_14 = arith.constant 2 : i32
    %22 = arith.addi %21, %c2_i32_14 : i32
    %23 = arith.index_cast %22 : i32 to index
    %24 = memref.load %arg2[%23] : memref<18xf32, #tpu.memory_space<smem>>
    %25 = vector.broadcast %14 : f32 to vector<1x128xf32>
    %26 = arith.mulf %25, %3 : vector<1x128xf32>
    %27 = vector.broadcast %19 : f32 to vector<1x128xf32>
    %28 = arith.mulf %27, %5 : vector<1x128xf32>
    %29 = arith.addf %26, %28 : vector<1x128xf32>
    %30 = vector.broadcast %24 : f32 to vector<1x128xf32>
    %31 = arith.addf %29, %30 : vector<1x128xf32>
    %c0_15 = arith.constant 0 : index
    %c0_16 = arith.constant 0 : index
    %c0_17 = arith.constant 0 : index
    %32 = vector.load %arg4[%c0_15, %c0_16, %c0_17] : memref<2x3x128xf32, #tpu.memory_space<vmem>>, vector<1x1x128xf32>
    %33 = vector.shape_cast %32 : vector<1x1x128xf32> to vector<1x128xf32>
    %34 = vector.shape_cast %31 : vector<1x128xf32> to vector<1x1x128xf32>
    tpu.vector_store %arg4[%c0_15, %c0_16, %c0_17], %34 {strides = array<i32>} : memref<2x3x128xf32, #tpu.memory_space<vmem>>, vector<1x1x128xf32>,
    %35 = vector.broadcast %14 : f32 to vector<1x128xf32>
    %36 = arith.mulf %35, %7 : vector<1x128xf32>
    %37 = vector.broadcast %19 : f32 to vector<1x128xf32>
    %38 = arith.mulf %37, %9 : vector<1x128xf32>
    %39 = arith.addf %36, %38 : vector<1x128xf32>
    %40 = vector.broadcast %24 : f32 to vector<1x128xf32>
    %41 = arith.addf %39, %40 : vector<1x128xf32>
    %c0_18 = arith.constant 0 : index
    %c0_19 = arith.constant 0 : index
    %c0_20 = arith.constant 0 : index
    %42 = vector.load %arg5[%c0_18, %c0_19, %c0_20] : memref<2x3x128xf32, #tpu.memory_space<vmem>>, vector<1x1x128xf32>
    %43 = vector.shape_cast %42 : vector<1x1x128xf32> to vector<1x128xf32>
    %44 = vector.shape_cast %41 : vector<1x128xf32> to vector<1x1x128xf32>
    tpu.vector_store %arg5[%c0_18, %c0_19, %c0_20], %44 {strides = array<i32>} : memref<2x3x128xf32, #tpu.memory_space<vmem>>, vector<1x1x128xf32>,
    %c9_i32_21 = arith.constant 9 : i32
    %45 = arith.muli %1, %c9_i32_21 : i32
    %c3_i32 = arith.constant 3 : i32
    %46 = arith.addi %45, %c3_i32 : i32
    %c0_i32_22 = arith.constant 0 : i32
    %47 = arith.addi %46, %c0_i32_22 : i32
    %48 = arith.index_cast %47 : i32 to index
    %49 = memref.load %arg2[%48] : memref<18xf32, #tpu.memory_space<smem>>
    %c9_i32_23 = arith.constant 9 : i32
    %50 = arith.muli %1, %c9_i32_23 : i32
    %c3_i32_24 = arith.constant 3 : i32
    %51 = arith.addi %50, %c3_i32_24 : i32
    %c1_i32_25 = arith.constant 1 : i32
    %52 = arith.addi %51, %c1_i32_25 : i32
    %53 = arith.index_cast %52 : i32 to index
    %54 = memref.load %arg2[%53] : memref<18xf32, #tpu.memory_space<smem>>
    %c9_i32_26 = arith.constant 9 : i32
    %55 = arith.muli %1, %c9_i32_26 : i32
    %c3_i32_27 = arith.constant 3 : i32
    %56 = arith.addi %55, %c3_i32_27 : i32
    %c2_i32_28 = arith.constant 2 : i32
    %57 = arith.addi %56, %c2_i32_28 : i32
    %58 = arith.index_cast %57 : i32 to index
    %59 = memref.load %arg2[%58] : memref<18xf32, #tpu.memory_space<smem>>
    %60 = vector.broadcast %49 : f32 to vector<1x128xf32>
    %61 = arith.mulf %60, %3 : vector<1x128xf32>
    %62 = vector.broadcast %54 : f32 to vector<1x128xf32>
    %63 = arith.mulf %62, %5 : vector<1x128xf32>
    %64 = arith.addf %61, %63 : vector<1x128xf32>
    %65 = vector.broadcast %59 : f32 to vector<1x128xf32>
    %66 = arith.addf %64, %65 : vector<1x128xf32>
    %c0_29 = arith.constant 0 : index
    %c1_30 = arith.constant 1 : index
    %c0_31 = arith.constant 0 : index
    %67 = vector.load %arg4[%c0_29, %c1_30, %c0_31] : memref<2x3x128xf32, #tpu.memory_space<vmem>>, vector<1x1x128xf32>
    %68 = vector.shape_cast %67 : vector<1x1x128xf32> to vector<1x128xf32>
    %69 = vector.shape_cast %66 : vector<1x128xf32> to vector<1x1x128xf32>
    tpu.vector_store %arg4[%c0_29, %c1_30, %c0_31], %69 {strides = array<i32>} : memref<2x3x128xf32, #tpu.memory_space<vmem>>, vector<1x1x128xf32>,
    %70 = vector.broadcast %49 : f32 to vector<1x128xf32>
    %71 = arith.mulf %70, %7 : vector<1x128xf32>
    %72 = vector.broadcast %54 : f32 to vector<1x128xf32>
    %73 = arith.mulf %72, %9 : vector<1x128xf32>
    %74 = arith.addf %71, %73 : vector<1x128xf32>
    %75 = vector.broadcast %59 : f32 to vector<1x128xf32>
    %76 = arith.addf %74, %75 : vector<1x128xf32>
    %c0_32 = arith.constant 0 : index
    %c1_33 = arith.constant 1 : index
    %c0_34 = arith.constant 0 : index
    %77 = vector.load %arg5[%c0_32, %c1_33, %c0_34] : memref<2x3x128xf32, #tpu.memory_space<vmem>>, vector<1x1x128xf32>
    %78 = vector.shape_cast %77 : vector<1x1x128xf32> to vector<1x128xf32>
    %79 = vector.shape_cast %76 : vector<1x128xf32> to vector<1x1x128xf32>
    tpu.vector_store %arg5[%c0_32, %c1_33, %c0_34], %79 {strides = array<i32>} : memref<2x3x128xf32, #tpu.memory_space<vmem>>, vector<1x1x128xf32>,
    %c9_i32_35 = arith.constant 9 : i32
    %80 = arith.muli %1, %c9_i32_35 : i32
    %c6_i32 = arith.constant 6 : i32
    %81 = arith.addi %80, %c6_i32 : i32
    %c0_i32_36 = arith.constant 0 : i32
    %82 = arith.addi %81, %c0_i32_36 : i32
    %83 = arith.index_cast %82 : i32 to index
    %84 = memref.load %arg2[%83] : memref<18xf32, #tpu.memory_space<smem>>
    %c9_i32_37 = arith.constant 9 : i32
    %85 = arith.muli %1, %c9_i32_37 : i32
    %c6_i32_38 = arith.constant 6 : i32
    %86 = arith.addi %85, %c6_i32_38 : i32
    %c1_i32_39 = arith.constant 1 : i32
    %87 = arith.addi %86, %c1_i32_39 : i32
    %88 = arith.index_cast %87 : i32 to index
    %89 = memref.load %arg2[%88] : memref<18xf32, #tpu.memory_space<smem>>
    %c9_i32_40 = arith.constant 9 : i32
    %90 = arith.muli %1, %c9_i32_40 : i32
    %c6_i32_41 = arith.constant 6 : i32
    %91 = arith.addi %90, %c6_i32_41 : i32
    %c2_i32_42 = arith.constant 2 : i32
    %92 = arith.addi %91, %c2_i32_42 : i32
    %93 = arith.index_cast %92 : i32 to index
    %94 = memref.load %arg2[%93] : memref<18xf32, #tpu.memory_space<smem>>
    %95 = vector.broadcast %84 : f32 to vector<1x128xf32>
    %96 = arith.mulf %95, %3 : vector<1x128xf32>
    %97 = vector.broadcast %89 : f32 to vector<1x128xf32>
    %98 = arith.mulf %97, %5 : vector<1x128xf32>
    %99 = arith.addf %96, %98 : vector<1x128xf32>
    %100 = vector.broadcast %94 : f32 to vector<1x128xf32>
    %101 = arith.addf %99, %100 : vector<1x128xf32>
    %c0_43 = arith.constant 0 : index
    %c2_44 = arith.constant 2 : index
    %c0_45 = arith.constant 0 : index
    %102 = vector.load %arg4[%c0_43, %c2_44, %c0_45] : memref<2x3x128xf32, #tpu.memory_space<vmem>>, vector<1x1x128xf32>
    %103 = vector.shape_cast %102 : vector<1x1x128xf32> to vector<1x128xf32>
    %104 = vector.shape_cast %101 : vector<1x128xf32> to vector<1x1x128xf32>
    tpu.vector_store %arg4[%c0_43, %c2_44, %c0_45], %104 {strides = array<i32>} : memref<2x3x128xf32, #tpu.memory_space<vmem>>, vector<1x1x128xf32>,
    %105 = vector.broadcast %84 : f32 to vector<1x128xf32>
    %106 = arith.mulf %105, %7 : vector<1x128xf32>
    %107 = vector.broadcast %89 : f32 to vector<1x128xf32>
    %108 = arith.mulf %107, %9 : vector<1x128xf32>
    %109 = arith.addf %106, %108 : vector<1x128xf32>
    %110 = vector.broadcast %94 : f32 to vector<1x128xf32>
    %111 = arith.addf %109, %110 : vector<1x128xf32>
    %c0_46 = arith.constant 0 : index
    %c2_47 = arith.constant 2 : index
    %c0_48 = arith.constant 0 : index
    %112 = vector.load %arg5[%c0_46, %c2_47, %c0_48] : memref<2x3x128xf32, #tpu.memory_space<vmem>>, vector<1x1x128xf32>
    %113 = vector.shape_cast %112 : vector<1x1x128xf32> to vector<1x128xf32>
    %114 = vector.shape_cast %111 : vector<1x128xf32> to vector<1x1x128xf32>
    tpu.vector_store %arg5[%c0_46, %c2_47, %c0_48], %114 {strides = array<i32>} : memref<2x3x128xf32, #tpu.memory_space<vmem>>, vector<1x1x128xf32>,
    %c1_i32_49 = arith.constant 1 : i32
    %115 = arith.addi %0, %c1_i32_49 : i32
    %c1_50 = arith.constant 1 : index
    %c0_51 = arith.constant 0 : index
    %c0_52 = arith.constant 0 : index
    %116 = vector.load %arg3[%c1_50, %c0_51, %c0_52] : memref<2x4x128xf32, #tpu.memory_space<vmem>>, vector<1x1x128xf32>
    %117 = vector.shape_cast %116 : vector<1x1x128xf32> to vector<1x128xf32>
    %c1_53 = arith.constant 1 : index
    %c1_54 = arith.constant 1 : index
    %c0_55 = arith.constant 0 : index
    %118 = vector.load %arg3[%c1_53, %c1_54, %c0_55] : memref<2x4x128xf32, #tpu.memory_space<vmem>>, vector<1x1x128xf32>
    %119 = vector.shape_cast %118 : vector<1x1x128xf32> to vector<1x128xf32>
    %c1_56 = arith.constant 1 : index
    %c2_57 = arith.constant 2 : index
    %c0_58 = arith.constant 0 : index
    %120 = vector.load %arg3[%c1_56, %c2_57, %c0_58] : memref<2x4x128xf32, #tpu.memory_space<vmem>>, vector<1x1x128xf32>
    %121 = vector.shape_cast %120 : vector<1x1x128xf32> to vector<1x128xf32>
    %c1_59 = arith.constant 1 : index
    %c3_60 = arith.constant 3 : index
    %c0_61 = arith.constant 0 : index
    %122 = vector.load %arg3[%c1_59, %c3_60, %c0_61] : memref<2x4x128xf32, #tpu.memory_space<vmem>>, vector<1x1x128xf32>
    %123 = vector.shape_cast %122 : vector<1x1x128xf32> to vector<1x128xf32>
    %c9_i32_62 = arith.constant 9 : i32
    %124 = arith.muli %115, %c9_i32_62 : i32
    %c0_i32_63 = arith.constant 0 : i32
    %125 = arith.addi %124, %c0_i32_63 : i32
    %c0_i32_64 = arith.constant 0 : i32
    %126 = arith.addi %125, %c0_i32_64 : i32
    %127 = arith.index_cast %126 : i32 to index
    %128 = memref.load %arg2[%127] : memref<18xf32, #tpu.memory_space<smem>>
    %c9_i32_65 = arith.constant 9 : i32
    %129 = arith.muli %115, %c9_i32_65 : i32
    %c0_i32_66 = arith.constant 0 : i32
    %130 = arith.addi %129, %c0_i32_66 : i32
    %c1_i32_67 = arith.constant 1 : i32
    %131 = arith.addi %130, %c1_i32_67 : i32
    %132 = arith.index_cast %131 : i32 to index
    %133 = memref.load %arg2[%132] : memref<18xf32, #tpu.memory_space<smem>>
    %c9_i32_68 = arith.constant 9 : i32
    %134 = arith.muli %115, %c9_i32_68 : i32
    %c0_i32_69 = arith.constant 0 : i32
    %135 = arith.addi %134, %c0_i32_69 : i32
    %c2_i32_70 = arith.constant 2 : i32
    %136 = arith.addi %135, %c2_i32_70 : i32
    %137 = arith.index_cast %136 : i32 to index
    %138 = memref.load %arg2[%137] : memref<18xf32, #tpu.memory_space<smem>>
    %139 = vector.broadcast %128 : f32 to vector<1x128xf32>
    %140 = arith.mulf %139, %117 : vector<1x128xf32>
    %141 = vector.broadcast %133 : f32 to vector<1x128xf32>
    %142 = arith.mulf %141, %119 : vector<1x128xf32>
    %143 = arith.addf %140, %142 : vector<1x128xf32>
    %144 = vector.broadcast %138 : f32 to vector<1x128xf32>
    %145 = arith.addf %143, %144 : vector<1x128xf32>
    %c1_71 = arith.constant 1 : index
    %c0_72 = arith.constant 0 : index
    %c0_73 = arith.constant 0 : index
    %146 = vector.load %arg4[%c1_71, %c0_72, %c0_73] : memref<2x3x128xf32, #tpu.memory_space<vmem>>, vector<1x1x128xf32>
    %147 = vector.shape_cast %146 : vector<1x1x128xf32> to vector<1x128xf32>
    %148 = vector.shape_cast %145 : vector<1x128xf32> to vector<1x1x128xf32>
    tpu.vector_store %arg4[%c1_71, %c0_72, %c0_73], %148 {strides = array<i32>} : memref<2x3x128xf32, #tpu.memory_space<vmem>>, vector<1x1x128xf32>,
    %149 = vector.broadcast %128 : f32 to vector<1x128xf32>
    %150 = arith.mulf %149, %121 : vector<1x128xf32>
    %151 = vector.broadcast %133 : f32 to vector<1x128xf32>
    %152 = arith.mulf %151, %123 : vector<1x128xf32>
    %153 = arith.addf %150, %152 : vector<1x128xf32>
    %154 = vector.broadcast %138 : f32 to vector<1x128xf32>
    %155 = arith.addf %153, %154 : vector<1x128xf32>
    %c1_74 = arith.constant 1 : index
    %c0_75 = arith.constant 0 : index
    %c0_76 = arith.constant 0 : index
    %156 = vector.load %arg5[%c1_74, %c0_75, %c0_76] : memref<2x3x128xf32, #tpu.memory_space<vmem>>, vector<1x1x128xf32>
    %157 = vector.shape_cast %156 : vector<1x1x128xf32> to vector<1x128xf32>
    %158 = vector.shape_cast %155 : vector<1x128xf32> to vector<1x1x128xf32>
    tpu.vector_store %arg5[%c1_74, %c0_75, %c0_76], %158 {strides = array<i32>} : memref<2x3x128xf32, #tpu.memory_space<vmem>>, vector<1x1x128xf32>,
    %c9_i32_77 = arith.constant 9 : i32
    %159 = arith.muli %115, %c9_i32_77 : i32
    %c3_i32_78 = arith.constant 3 : i32
    %160 = arith.addi %159, %c3_i32_78 : i32
    %c0_i32_79 = arith.constant 0 : i32
    %161 = arith.addi %160, %c0_i32_79 : i32
    %162 = arith.index_cast %161 : i32 to index
    %163 = memref.load %arg2[%162] : memref<18xf32, #tpu.memory_space<smem>>
    %c9_i32_80 = arith.constant 9 : i32
    %164 = arith.muli %115, %c9_i32_80 : i32
    %c3_i32_81 = arith.constant 3 : i32
    %165 = arith.addi %164, %c3_i32_81 : i32
    %c1_i32_82 = arith.constant 1 : i32
    %166 = arith.addi %165, %c1_i32_82 : i32
    %167 = arith.index_cast %166 : i32 to index
    %168 = memref.load %arg2[%167] : memref<18xf32, #tpu.memory_space<smem>>
    %c9_i32_83 = arith.constant 9 : i32
    %169 = arith.muli %115, %c9_i32_83 : i32
    %c3_i32_84 = arith.constant 3 : i32
    %170 = arith.addi %169, %c3_i32_84 : i32
    %c2_i32_85 = arith.constant 2 : i32
    %171 = arith.addi %170, %c2_i32_85 : i32
    %172 = arith.index_cast %171 : i32 to index
    %173 = memref.load %arg2[%172] : memref<18xf32, #tpu.memory_space<smem>>
    %174 = vector.broadcast %163 : f32 to vector<1x128xf32>
    %175 = arith.mulf %174, %117 : vector<1x128xf32>
    %176 = vector.broadcast %168 : f32 to vector<1x128xf32>
    %177 = arith.mulf %176, %119 : vector<1x128xf32>
    %178 = arith.addf %175, %177 : vector<1x128xf32>
    %179 = vector.broadcast %173 : f32 to vector<1x128xf32>
    %180 = arith.addf %178, %179 : vector<1x128xf32>
    %c1_86 = arith.constant 1 : index
    %c1_87 = arith.constant 1 : index
    %c0_88 = arith.constant 0 : index
    %181 = vector.load %arg4[%c1_86, %c1_87, %c0_88] : memref<2x3x128xf32, #tpu.memory_space<vmem>>, vector<1x1x128xf32>
    %182 = vector.shape_cast %181 : vector<1x1x128xf32> to vector<1x128xf32>
    %183 = vector.shape_cast %180 : vector<1x128xf32> to vector<1x1x128xf32>
    tpu.vector_store %arg4[%c1_86, %c1_87, %c0_88], %183 {strides = array<i32>} : memref<2x3x128xf32, #tpu.memory_space<vmem>>, vector<1x1x128xf32>,
    %184 = vector.broadcast %163 : f32 to vector<1x128xf32>
    %185 = arith.mulf %184, %121 : vector<1x128xf32>
    %186 = vector.broadcast %168 : f32 to vector<1x128xf32>
    %187 = arith.mulf %186, %123 : vector<1x128xf32>
    %188 = arith.addf %185, %187 : vector<1x128xf32>
    %189 = vector.broadcast %173 : f32 to vector<1x128xf32>
    %190 = arith.addf %188, %189 : vector<1x128xf32>
    %c1_89 = arith.constant 1 : index
    %c1_90 = arith.constant 1 : index
    %c0_91 = arith.constant 0 : index
    %191 = vector.load %arg5[%c1_89, %c1_90, %c0_91] : memref<2x3x128xf32, #tpu.memory_space<vmem>>, vector<1x1x128xf32>
    %192 = vector.shape_cast %191 : vector<1x1x128xf32> to vector<1x128xf32>
    %193 = vector.shape_cast %190 : vector<1x128xf32> to vector<1x1x128xf32>
    tpu.vector_store %arg5[%c1_89, %c1_90, %c0_91], %193 {strides = array<i32>} : memref<2x3x128xf32, #tpu.memory_space<vmem>>, vector<1x1x128xf32>,
    %c9_i32_92 = arith.constant 9 : i32
    %194 = arith.muli %115, %c9_i32_92 : i32
    %c6_i32_93 = arith.constant 6 : i32
    %195 = arith.addi %194, %c6_i32_93 : i32
    %c0_i32_94 = arith.constant 0 : i32
    %196 = arith.addi %195, %c0_i32_94 : i32
    %197 = arith.index_cast %196 : i32 to index
    %198 = memref.load %arg2[%197] : memref<18xf32, #tpu.memory_space<smem>>
    %c9_i32_95 = arith.constant 9 : i32
    %199 = arith.muli %115, %c9_i32_95 : i32
    %c6_i32_96 = arith.constant 6 : i32
    %200 = arith.addi %199, %c6_i32_96 : i32
    %c1_i32_97 = arith.constant 1 : i32
    %201 = arith.addi %200, %c1_i32_97 : i32
    %202 = arith.index_cast %201 : i32 to index
    %203 = memref.load %arg2[%202] : memref<18xf32, #tpu.memory_space<smem>>
    %c9_i32_98 = arith.constant 9 : i32
    %204 = arith.muli %115, %c9_i32_98 : i32
    %c6_i32_99 = arith.constant 6 : i32
    %205 = arith.addi %204, %c6_i32_99 : i32
    %c2_i32_100 = arith.constant 2 : i32
    %206 = arith.addi %205, %c2_i32_100 : i32
    %207 = arith.index_cast %206 : i32 to index
    %208 = memref.load %arg2[%207] : memref<18xf32, #tpu.memory_space<smem>>
    %209 = vector.broadcast %198 : f32 to vector<1x128xf32>
    %210 = arith.mulf %209, %117 : vector<1x128xf32>
    %211 = vector.broadcast %203 : f32 to vector<1x128xf32>
    %212 = arith.mulf %211, %119 : vector<1x128xf32>
    %213 = arith.addf %210, %212 : vector<1x128xf32>
    %214 = vector.broadcast %208 : f32 to vector<1x128xf32>
    %215 = arith.addf %213, %214 : vector<1x128xf32>
    %c1_101 = arith.constant 1 : index
    %c2_102 = arith.constant 2 : index
    %c0_103 = arith.constant 0 : index
    %216 = vector.load %arg4[%c1_101, %c2_102, %c0_103] : memref<2x3x128xf32, #tpu.memory_space<vmem>>, vector<1x1x128xf32>
    %217 = vector.shape_cast %216 : vector<1x1x128xf32> to vector<1x128xf32>
    %218 = vector.shape_cast %215 : vector<1x128xf32> to vector<1x1x128xf32>
    tpu.vector_store %arg4[%c1_101, %c2_102, %c0_103], %218 {strides = array<i32>} : memref<2x3x128xf32, #tpu.memory_space<vmem>>, vector<1x1x128xf32>,
    %219 = vector.broadcast %198 : f32 to vector<1x128xf32>
    %220 = arith.mulf %219, %121 : vector<1x128xf32>
    %221 = vector.broadcast %203 : f32 to vector<1x128xf32>
    %222 = arith.mulf %221, %123 : vector<1x128xf32>
    %223 = arith.addf %220, %222 : vector<1x128xf32>
    %224 = vector.broadcast %208 : f32 to vector<1x128xf32>
    %225 = arith.addf %223, %224 : vector<1x128xf32>
    %c1_104 = arith.constant 1 : index
    %c2_105 = arith.constant 2 : index
    %c0_106 = arith.constant 0 : index
    %226 = vector.load %arg5[%c1_104, %c2_105, %c0_106] : memref<2x3x128xf32, #tpu.memory_space<vmem>>, vector<1x1x128xf32>
    %227 = vector.shape_cast %226 : vector<1x1x128xf32> to vector<1x128xf32>
    %228 = vector.shape_cast %225 : vector<1x128xf32> to vector<1x1x128xf32>
    tpu.vector_store %arg5[%c1_104, %c2_105, %c0_106], %228 {strides = array<i32>} : memref<2x3x128xf32, #tpu.memory_space<vmem>>, vector<1x1x128xf32>,
    return
  }
  func.func @transform_0(%arg0: i32, %arg1: i32, %arg2: memref<18xf32, #tpu.memory_space<smem>>) -> (i32, i32, i32) {
    %c0_i32 = arith.constant 0 : i32
    %c0_i32_0 = arith.constant 0 : i32
    return %arg0, %c0_i32, %arg1 : i32, i32, i32
  }
  func.func @transform_1(%arg0: i32, %arg1: i32, %arg2: memref<18xf32, #tpu.memory_space<smem>>) -> (i32, i32, i32) {
    %c0_i32 = arith.constant 0 : i32
    %c0_i32_0 = arith.constant 0 : i32
    return %arg0, %c0_i32, %arg1 : i32, i32, i32
  }
  func.func @transform_2(%arg0: i32, %arg1: i32, %arg2: memref<18xf32, #tpu.memory_space<smem>>) -> (i32, i32, i32) {
    %c0_i32 = arith.constant 0 : i32
    %c0_i32_0 = arith.constant 0 : i32
    return %arg0, %c0_i32, %arg1 : i32, i32, i32
  }
}

</mosaic_0001>

<bundles_post_ra>
// kernel: tpu_custom_call.1
= control target key start
LH: loop header
LB: loop body
LE: loop exit
PB: predicated region body
PF: predicated region fallthrough
CT: control target
= control target key end

     0   :  { %s354_s0 = inlined_call_operand.hbm [shape: f32[18], index: 0, kind: input, shape index: {}]   ;;  %s355_s1 = inlined_call_operand.hbm [shape: f32[2,4,128], index: 1, kind: input, shape index: {}]   ;;  %s356_s2 = inlined_call_operand.vmem [shape: f32[2,3,128], index: 2, kind: output, shape index: {0}]   ;;  %s357_s3 = inlined_call_operand.vmem [shape: f32[2,3,128], index: 3, kind: output, shape index: {1}]  }
   0x1   :  { %s192_s14 = scalar_lea.hbm %s354_s0, 16 }
   0x2   :  { %p193_p0 = scmp.ne.s32.totalorder %s354_s0, %s192_s14  ;;  %p196_p1 = scmp.lt.u32.totalorder %s192_s14, %s354_s0 }
   0x4   :  { %p198_p2 = pnand %p196_p1, %p193_p0 }
   0x6   :  { %201 = shalt.err (!%p198_p2)  }
   0x7   :  { %s228_s19 = smov [#allocation3]  }
   0x8   :  { %10 = dma.hbm_to_smem %s354_s0, 16, %s228_s19, [#allocation2] }
   0x9   :  { %224 = dma.done.wait [#allocation2], 16 }
   0xa   :  { %225 = vsyncadd [#allocation2], 4294967280 }
   0xb   :  { %12 = sfence }
   0xc   :  { %13 = vsyncpa [#allocation5], 0  ;;  %s229_s22 = smov [#allocation4]   ;;  %s202_s26 = scalar_lea.hbm %s355_s1, 128 }
   0xd   :  { %s19_s23 = sshll.u32 %s229_s22, 4  ;;  %p203_p3 = scmp.ne.s32.totalorder %s355_s1, %s202_s26  ;;  %s20_s23 = int_to_ptr.vmem [resolvable:$true] %s19_s23 }
   0xe   :  { %p206_p4 = scmp.lt.u32.totalorder %s202_s26, %s355_s1 }
  0x10   :  { %p208_p5 = pnand %p206_p4, %p203_p3 }
  0x12   :  { %211 = shalt.err (!%p208_p5)
}
  0x13   :  { %s212_s0 = scalar_lea.vmem %s20_s23, 128  ;;  %p217_p7 = scmp.lt.s32.totalorder %s20_s23, %s20_s23 }
  0x14   :  { %p213_p6 = scmp.ne.s32.totalorder %s20_s23, %s212_s0  ;;  %p218_p8 = scmp.lt.s32.totalorder %s212_s0, %s212_s0 }
  0x16   :  { %p219_p9 = por %p218_p8, %p217_p7 }
  0x18   :  { %p220_p10 = pnand %p219_p9, %p213_p6 }
  0x1a   :  { %223 = shalt.err (!%p220_p10)
}
  0x1b   :  { %s230_s4 = smov 64   ;;  %s231_s5 = smov 4  }
  0x1c   :  { %25 = dma.hbm_to_vmem [thread:$0]  %s355_s1, 128, %s20_s23, [#allocation5], %s230_s4, %s230_s4, %s231_s5  }
  0x1d   :  { %226 = dma.done.wait [#allocation5], 128  }
  0x1e   :  { %227 = vsyncadd [#allocation5], 4294967168  ;;  %s35_s8 = sld [smem:[#allocation3]]  ;;  %s165_s9 = sld [smem:[#allocation3 + $0x1]]  ;;  %v30_v0 = vld [vmem:[#allocation4] sm:$0x1] }
  0x1f   :  { %s276_s10 = sld [smem:[#allocation3 + $0x2]]  ;;  %s167_s11 = sld [smem:[#allocation3 + $0x3]]  ;;  %v31_v1 = vld [vmem:[#allocation4 + $0x1] sm:$0x1]  ;;  %v32_v4 = vld [vmem:[#allocation4 + $0x2] sm:$0x1] }
  0x20   :  { %s168_s12 = sld [smem:[#allocation3 + $0x4]]  ;;  %s278_s13 = sld [smem:[#allocation3 + $0x5]]  ;;  %v33_v8 = vld [vmem:[#allocation4 + $0x3] sm:$0x1]  ;;  %v93_v26 = vld [vmem:[#allocation4 + $0x4] sm:$0x1] }
  0x21   :  { %s280_s14 = sld [smem:[#allocation3 + $0x6]]  ;;  %s282_s15 = sld [smem:[#allocation3 + $0x7]]  ;;  %v94_v31 = vld [vmem:[#allocation4 + $0x5] sm:$0x1]  ;;  %v95_v32 = vld [vmem:[#allocation4 + $0x6] sm:$0x1] }
  0x22   :  { %s284_s16 = sld [smem:[#allocation3 + $0x8]]  ;;  %s286_s17 = sld [smem:[#allocation3 + $0x9]]  ;;  %v96_v37 = vld [vmem:[#allocation4 + $0x7] sm:$0x1] }
  0x23   :  { %s288_s1 = sld [smem:[#allocation3 + $0xa]]  ;;  %s290_s18 = sld [smem:[#allocation3 + $0xb]] }
  0x24   :  { %v40_v2 = vstv %s35_s8  ;;  %v42_v3 = vstv %s165_s9  ;;  %s294_s19 = sld [smem:[#allocation3 + $0xc]]  ;;  %s296_s20 = sld [smem:[#allocation3 + $0xd]] }
  0x25   :  { %v41_v5 = vmul.f32 %v40_v2, %v30_v0  ;;  %v43_v6 = vmul.f32 %v42_v3, %v31_v1  ;;  %v45_v7 = vstv %s276_s10  ;;  %v48_v9 = vmul.f32 %v40_v2, %v32_v4  ;;  %s298_s21 = sld [smem:[#allocation3 + $0xe]]  ;;  %s302_s22 = sld [smem:[#allocation3 + $0xf]] }
  0x26   :  { %v49_v10 = vmul.f32 %v42_v3, %v33_v8  ;;  %v59_v11 = vstv %s167_s11  ;;  %v61_v12 = vstv %s168_s12  ;;  %v64_v13 = vstv %s278_s13  ;;  %s304_s23 = sld [smem:[#allocation3 + $0x10]]  ;;  %s311_s26 = sld [smem:[#allocation3 + $0x11]] }
  0x27   :  { %v44_v14 = vadd.f32 %v43_v6, %v41_v5  ;;  %v60_v15 = vmul.f32 %v59_v11, %v30_v0  ;;  %v62_v16 = vmul.f32 %v61_v12, %v31_v1  ;;  %v67_v17 = vmul.f32 %v59_v11, %v32_v4 }
  0x28   :  { %v50_v18 = vadd.f32 %v49_v10, %v48_v9  ;;  %v68_v19 = vmul.f32 %v61_v12, %v33_v8  ;;  %v78_v20 = vstv %s280_s14  ;;  %v80_v21 = vstv %s282_s15 }
  0x29   :  { %v46_v22 = vadd.f32 %v45_v7, %v44_v14  ;;  %v63_v23 = vadd.f32 %v62_v16, %v60_v15  ;;  %v79_v24 = vmul.f32 %v78_v20, %v30_v0  ;;  %v81_v25 = vmul.f32 %v80_v21, %v31_v1 }
  0x2a   :  { %v51_v27 = vadd.f32 %v50_v18, %v45_v7  ;;  %v69_v28 = vadd.f32 %v68_v19, %v67_v17  ;;  %v83_v29 = vstv %s284_s16  ;;  %v86_v30 = vmul.f32 %v78_v20, %v32_v4 }
  0x2b   :  { %47 = vst [vmem:[%s356_s2] sm:$0x1] %v46_v22  ;;  %v65_v33 = vadd.f32 %v64_v13, %v63_v23  ;;  %v82_v34 = vadd.f32 %v81_v25, %v79_v24  ;;  %v87_v35 = vmul.f32 %v80_v21, %v33_v8  ;;  %v103_v36 = vstv %s286_s17 }
  0x2c   :  { %52 = vst [vmem:[%s357_s3] sm:$0x1] %v51_v27  ;;  %v70_v38 = vadd.f32 %v69_v28, %v64_v13  ;;  %v104_v39 = vmul.f32 %v103_v36, %v93_v26  ;;  %v105_v40 = vstv %s288_s1  ;;  %v108_v41 = vstv %s290_s18 }
  0x2d   :  { %66 = vst [vmem:[%s356_s2 + $0x1] sm:$0x1] %v65_v33  ;;  %v84_v42 = vadd.f32 %v83_v29, %v82_v34  ;;  %v88_v43 = vadd.f32 %v87_v35, %v86_v30  ;;  %v106_v44 = vmul.f32 %v105_v40, %v94_v31  ;;  %v112_v45 = vmul.f32 %v103_v36, %v95_v32 }
  0x2e   :  { %71 = vst [vmem:[%s357_s3 + $0x1] sm:$0x1] %v70_v38  ;;  %v113_v46 = vmul.f32 %v105_v40, %v96_v37  ;;  %v124_v47 = vstv %s294_s19  ;;  %v126_v48 = vstv %s296_s20  ;;  %v129_v49 = vstv %s298_s21 }
  0x2f   :  { %85 = vst [vmem:[%s356_s2 + $0x2] sm:$0x1] %v84_v42  ;;  %v89_v50 = vadd.f32 %v88_v43, %v83_v29  ;;  %v107_v51 = vadd.f32 %v106_v44, %v104_v39  ;;  %v125_v52 = vmul.f32 %v124_v47, %v93_v26  ;;  %v127_v53 = vmul.f32 %v126_v48, %v94_v31 }
  0x30   :  { %v114_v54 = vadd.f32 %v113_v46, %v112_v45  ;;  %v132_v55 = vmul.f32 %v124_v47, %v95_v32  ;;  %v133_v56 = vmul.f32 %v126_v48, %v96_v37  ;;  %v143_v57 = vstv %s302_s22 }
  0x31   :  { %90 = vst [vmem:[%s357_s3 + $0x2] sm:$0x1] %v89_v50  ;;  %v109_v58 = vadd.f32 %v108_v41, %v107_v51  ;;  %v128_v59 = vadd.f32 %v127_v53, %v125_v52  ;;  %v144_v60 = vmul.f32 %v143_v57, %v93_v26  ;;  %v145_v61 = vstv %s304_s23 }
  0x32   :  { %v115_v62 = vadd.f32 %v114_v54, %v108_v41  ;;  %v134_v63 = vadd.f32 %v133_v56, %v132_v55  ;;  %v146_v0 = vmul.f32 %v145_v61, %v94_v31  ;;  %v148_v2 = vstv %s311_s26 }
  0x33   :  { %176 = vst [vmem:[%s356_s2 + $0x4] sm:$0x1] %v109_v58  ;;  %v130_v1 = vadd.f32 %v129_v49, %v128_v59  ;;  %v151_v3 = vmul.f32 %v143_v57, %v95_v32  ;;  %v152_v4 = vmul.f32 %v145_v61, %v96_v37 }
  0x34   :  { %177 = vst [vmem:[%s357_s3 + $0x4] sm:$0x1] %v115_v62  ;;  %v135_v5 = vadd.f32 %v134_v63, %v129_v49  ;;  %v147_v6 = vadd.f32 %v146_v0, %v144_v60 }
  0x35   :  { %181 = vst [vmem:[%s356_s2 + $0x5] sm:$0x1] %v130_v1  ;;  %v153_v7 = vadd.f32 %v152_v4, %v151_v3 }
  0x36   :  { %182 = vst [vmem:[%s357_s3 + $0x5] sm:$0x1] %v135_v5  ;;  %v149_v8 = vadd.f32 %v148_v2, %v147_v6 }
  0x37   :  { %v154_v9 = vadd.f32 %v153_v7, %v148_v2 }
  0x38   :  { %186 = vst [vmem:[%s356_s2 + $0x6] sm:$0x1] %v149_v8 }
  0x39   :  { %187 = vst [vmem:[%s357_s3 + $0x6] sm:$0x1] %v154_v9 }
  0x3a   :  { %164 = vsyncpa [#allocation5], 1 }

</bundles_post_ra>
